<compile_context>
chip_gen: v6e
topology: v6e:2x2x1
jax: 0.10.0
libtpu: 0.0.40
codegen_flags: <defaults>
</compile_context>

<pallas_src>
import math
import functools

import jax
import jax.numpy as jnp
from jax import lax
from jax.experimental import pallas as pl
from jax.experimental.pallas import tpu as pltpu


# Module defaults from the PyTorch spec.
D_NODE, D_HIDDEN, D_PAIR, D_HEAD = 256, 32, 128, 16
LN_EPS = 1e-5


def _pick_tile(L, cap):
    """Largest power-of-two tile <= cap that divides L; fallback: full extent."""
    t = cap
    while t >= 8:
        if t <= L and L % t == 0:
            return t
        t //= 2
    return L


# =============================================================================
# Stage 1 (O(L)): fused LayerNorm + mask + left/right projections.
#   node [t, D], mask [t, 1], gamma/beta [1, D], w [D, F], b [1, F]
#   -> left [t, F] (f32), right [t, F] (f32, already scaled by 1/sqrt(F))
# =============================================================================
def _ln_proj_kernel(node_ref, mask_ref, gamma_ref, beta_ref,
                    wl_ref, bl_ref, wr_ref, br_ref,
                    left_ref, right_ref, *, inv_sqrt_dh, ln_eps):
    x = node_ref[...]                                        # [t, D]
    mu = jnp.mean(x, axis=-1, keepdims=True)
    xc = x - mu
    var = jnp.mean(xc * xc, axis=-1, keepdims=True)
    xn = xc * lax.rsqrt(var + ln_eps)
    xn = (xn * gamma_ref[...] + beta_ref[...]) * mask_ref[...]
    left_ref[...] = (jnp.dot(xn, wl_ref[...], preferred_element_type=jnp.float32)
                     + bl_ref[...]).astype(left_ref.dtype)
    right_ref[...] = ((jnp.dot(xn, wr_ref[...], preferred_element_type=jnp.float32)
                       + br_ref[...]) * inv_sqrt_dh).astype(right_ref.dtype)


# =============================================================================
# Stage 2 (O(L^2)): outer product over pair axes + folded proj_out.
#   left [ti, F], right [tj, F] (f32) ; w_exp [F, P] (bf16) ; b_out [1, P] (f32)
#   out [ti, tj, P]  (P = d_pair = 128 -> lane-dense, unmasked stores)
# =============================================================================
def _pair_kernel(left_ref, right_ref, wexp_ref, bout_ref, out_ref):
    left = left_ref[...]                                     # [ti, F] f32
    right = right_ref[...]                                   # [tj, F] f32
    ti, F = left.shape
    tj = right.shape[0]
    P = wexp_ref.shape[1]

    # Broadcast product in f32 on the VPU (v5e has no bf16 VALUs); cast to
    # bf16 only at the MXU operand boundary, accumulate in f32.
    prod = left[:, None, :] * right[None, :, :]              # [ti, tj, F] f32
    prod_bf = prod.reshape(ti * tj, F).astype(jnp.bfloat16)
    out = jnp.dot(prod_bf, wexp_ref[...],
                  preferred_element_type=jnp.float32) + bout_ref[...]
    out_ref[...] = out.reshape(ti, tj, P).astype(out_ref.dtype)


# =============================================================================
# Wrapper
# =============================================================================
def node2pair_pallas(node, mask, params, *, out_dtype=jnp.bfloat16, tile_cap=128):
    B, L, D = node.shape
    F = params['w_left'].shape[1]                            # d_hidden
    H, P = params['w_out'].shape                             # d_head, d_pair
    K = F // H

    node_f32 = node.astype(jnp.float32)
    mask3 = mask.astype(jnp.float32)[..., None]              # [B, L, 1]
    gamma = params['gamma'].reshape(1, D).astype(jnp.float32)
    beta = params['beta'].reshape(1, D).astype(jnp.float32)
    w_l = params['w_left'].astype(jnp.float32)               # [D, F]
    b_l = params['b_left'].reshape(1, F).astype(jnp.float32)
    w_r = params['w_right'].astype(jnp.float32)              # [D, F]
    b_r = params['b_right'].reshape(1, F).astype(jnp.float32)
    # Fold proj_out onto the flattened (head, k) axis: W_exp[f, p] = W_out[f // K, p].
    # bf16 MXU operand (f32 accumulation at the dot).
    w_exp = jnp.repeat(params['w_out'], K, axis=0).astype(jnp.bfloat16)   # [F, P]
    b_out = params['b_out'].reshape(1, P).astype(jnp.float32)

    # ---------------- Stage 1: LN + mask + projections (grid over B, L) -----
    tl = _pick_tile(L, 256)
    ln_kernel = functools.partial(_ln_proj_kernel,
                                  inv_sqrt_dh=1.0 / math.sqrt(F), ln_eps=LN_EPS)

    def full2(shape):
        return pl.BlockSpec(shape, lambda b, i: (0,) * len(shape))

    left_all, right_all = pl.pallas_call(
        ln_kernel,
        out_shape=(jax.ShapeDtypeStruct((B, L, F), jnp.float32),
                   jax.ShapeDtypeStruct((B, L, F), jnp.float32)),
        grid_spec=pltpu.PrefetchScalarGridSpec(
            num_scalar_prefetch=0,
            grid=(B, L // tl),
            in_specs=[
                pl.BlockSpec((None, tl, D), lambda b, i: (b, i, 0)),
                pl.BlockSpec((None, tl, 1), lambda b, i: (b, i, 0)),
                full2((1, D)), full2((1, D)),                # gamma, beta
                full2((D, F)), full2((1, F)),                # w_l, b_l
                full2((D, F)), full2((1, F)),                # w_r, b_r
            ],
            out_specs=(pl.BlockSpec((None, tl, F), lambda b, i: (b, i, 0)),
                       pl.BlockSpec((None, tl, F), lambda b, i: (b, i, 0))),
        ),
        compiler_params=pltpu.CompilerParams(
            dimension_semantics=("parallel", "arbitrary")),
    )(node_f32, mask3, gamma, beta, w_l, b_l, w_r, b_r)

    # ---------------- Stage 2: O(L^2) pair tiles -----------------------------
    tile = _pick_tile(L, tile_cap)
    grid = (B, L // tile, L // tile)

    out_bytes = B * L * L * P * jnp.dtype(out_dtype).itemsize
    in_bytes = 2 * B * L * F * 4 * (L // tile) + F * P * 2 + P * 4
    cost = pl.CostEstimate(flops=2 * B * L * L * F * P + B * L * L * F,
                           transcendentals=0,
                           bytes_accessed=out_bytes + in_bytes)

    def full3(shape):
        return pl.BlockSpec(shape, lambda b, i, j: (0,) * len(shape))

    return pl.pallas_call(
        _pair_kernel,
        out_shape=jax.ShapeDtypeStruct((B, L, L, P), out_dtype),
        grid_spec=pltpu.PrefetchScalarGridSpec(
            num_scalar_prefetch=0,
            grid=grid,
            in_specs=[
                pl.BlockSpec((None, tile, F), lambda b, i, j: (b, i, 0)),   # left
                pl.BlockSpec((None, tile, F), lambda b, i, j: (b, j, 0)),   # right
                full3((F, P)), full3((1, P)),                               # w_exp, b_out
            ],
            out_specs=pl.BlockSpec((None, tile, tile, P),
                                   lambda b, i, j: (b, i, j, 0)),
        ),
        compiler_params=pltpu.CompilerParams(
            dimension_semantics=("parallel", "parallel", "arbitrary"),
            vmem_limit_bytes=48 * 1024 * 1024),
        cost_estimate=cost,
    )(left_all, right_all, w_exp, b_out)


# =============================================================================
# Pure-JAX reference (mirrors the PyTorch module line by line; f32 throughout)
# =============================================================================
def node2pair_reference(node, mask, params):
    B, L, D = node.shape
    F = params['w_left'].shape[1]
    H, P = params['w_out'].shape
    K = F // H

    mu = jnp.mean(node, axis=-1, keepdims=True)
    var = jnp.mean((node - mu) ** 2, axis=-1, keepdims=True)
    xn = (node - mu) / jnp.sqrt(var + LN_EPS)
    xn = xn * params['gamma'] + params['beta']
    xn = xn * mask.astype(jnp.float32)[..., None]

    left = (xn @ params['w_left'] + params['b_left']).reshape(B, L, H, K)
    right = ((xn @ params['w_right'] + params['b_right'])
             / math.sqrt(F)).reshape(B, L, H, K)
    scores = jnp.einsum('bihk,bjhk->bijh', left, right)
    return jnp.einsum('bijh,hp->bijp', scores, params['w_out']) + params['b_out']


# =============================================================================
# Deterministic parameter construction
# =============================================================================
def init_params(key, d_node=D_NODE, d_hidden=D_HIDDEN, d_pair=D_PAIR,
                d_head=D_HEAD):
    ks = jax.random.split(key, 5)

    def lin(k, din, dout):
        kw, kb = jax.random.split(k)
        return (jax.random.normal(kw, (din, dout), jnp.float32) / math.sqrt(din),
                0.02 * jax.random.normal(kb, (dout,), jnp.float32))

    w_left, b_left = lin(ks[0], d_node, d_hidden)
    w_right, b_right = lin(ks[1], d_node, d_hidden)
    w_out, b_out = lin(ks[2], d_head, d_pair)          # w_out = torch W_out.T
    gamma = 1.0 + 0.1 * jax.random.normal(ks[3], (d_node,), jnp.float32)
    beta = 0.1 * jax.random.normal(ks[4], (d_node,), jnp.float32)
    return dict(gamma=gamma, beta=beta,
                w_left=w_left, b_left=b_left,
                w_right=w_right, b_right=b_right,
                w_out=w_out, b_out=b_out)


if __name__ == "__main__":
    key = jax.random.PRNGKey(0)
    k_node, k_params, k_node2 = jax.random.split(key, 3)
    params = init_params(k_params)

    # ---- Small shape (module defaults; tile = 16, single grid step per batch)
    B, L = 2, 16
    node = jax.random.normal(k_node, (B, L, D_NODE), jnp.float32)
    mask = jnp.ones((B, L), jnp.float32).at[1, -3:].set(0.0)

    out_pallas = jax.block_until_ready(node2pair_pallas(node, mask, params))
    out_ref = node2pair_reference(node, mask, params)
    assert out_pallas.shape == (B, L, L, D_PAIR)
    assert out_pallas.dtype == jnp.bfloat16
    # Intended tolerance: bf16 MXU operands + bf16 output vs f32 reference.
    diff = float(jnp.max(jnp.abs(out_pallas.astype(jnp.float32) - out_ref)))
    assert jnp.allclose(out_pallas.astype(jnp.float32), out_ref,
                        rtol=2e-2, atol=2e-2), f"mismatch: max abs diff = {diff}"

    # ---- Larger shape to exercise the 128x128 tiling / pipelining path ------
    B2, L2 = 1, 256
    node2 = jax.random.normal(k_node2, (B2, L2, D_NODE), jnp.float32)
    mask2 = jnp.ones((B2, L2), jnp.float32).at[0, -5:].set(0.0)
    out2 = jax.block_until_ready(node2pair_pallas(node2, mask2, params))
    ref2 = node2pair_reference(node2, mask2, params)
    diff2 = float(jnp.max(jnp.abs(out2.astype(jnp.float32) - ref2)))
    assert jnp.allclose(out2.astype(jnp.float32), ref2,
                        rtol=2e-2, atol=2e-2), f"mismatch (L=256): max abs diff = {diff2}"

    print("KERNEL_OK")
</pallas_src>

<mosaic_0001>
module attributes {stable_mosaic.version = 11 : i64} {
  func.func @_ln_proj_kernel(%arg0: i32, %arg1: i32, %arg2: memref<1x16x256xf32, #tpu.memory_space<vmem>>, %arg3: memref<1x16x1xf32, #tpu.memory_space<vmem>>, %arg4: memref<1x256xf32, #tpu.memory_space<vmem>>, %arg5: memref<1x256xf32, #tpu.memory_space<vmem>>, %arg6: memref<256x32xf32, #tpu.memory_space<vmem>>, %arg7: memref<1x32xf32, #tpu.memory_space<vmem>>, %arg8: memref<256x32xf32, #tpu.memory_space<vmem>>, %arg9: memref<1x32xf32, #tpu.memory_space<vmem>>, %arg10: memref<1x16x32xf32, #tpu.memory_space<vmem>>, %arg11: memref<1x16x32xf32, #tpu.memory_space<vmem>>) attributes {dimension_semantics = [#tpu.dimension_semantics<parallel>, #tpu.dimension_semantics<arbitrary>], iteration_bounds = array<i64: 2, 1>, scalar_prefetch = 0 : i64, scratch_operands = 0 : i64, tpu.core_type = #tpu.core_type<tc>, window_params = [{transform_indices = @transform_0, window_bounds = array<i64: 1, 16, 256>}, {transform_indices = @transform_1, window_bounds = array<i64: 1, 16, 1>}, {pipeline_mode = #tpu.pipeline_mode<synchronous>, transform_indices = @transform_2, window_bounds = array<i64: 1, 256>}, {pipeline_mode = #tpu.pipeline_mode<synchronous>, transform_indices = @transform_3, window_bounds = array<i64: 1, 256>}, {pipeline_mode = #tpu.pipeline_mode<synchronous>, transform_indices = @transform_4, window_bounds = array<i64: 256, 32>}, {pipeline_mode = #tpu.pipeline_mode<synchronous>, transform_indices = @transform_5, window_bounds = array<i64: 1, 32>}, {pipeline_mode = #tpu.pipeline_mode<synchronous>, transform_indices = @transform_6, window_bounds = array<i64: 256, 32>}, {pipeline_mode = #tpu.pipeline_mode<synchronous>, transform_indices = @transform_7, window_bounds = array<i64: 1, 32>}, {transform_indices = @transform_8, window_bounds = array<i64: 1, 16, 32>}, {transform_indices = @transform_9, window_bounds = array<i64: 1, 16, 32>}]} {
    %c0 = arith.constant 0 : index
    %c0_0 = arith.constant 0 : index
    %c0_1 = arith.constant 0 : index
    %0 = vector.load %arg2[%c0, %c0_0, %c0_1] : memref<1x16x256xf32, #tpu.memory_space<vmem>>, vector<1x16x256xf32>
    %1 = vector.shape_cast %0 : vector<1x16x256xf32> to vector<16x256xf32>
    %cst = arith.constant dense<0.000000e+00> : vector<16xf32>
    %2 = vector.multi_reduction <add>, %1, %cst [1] : vector<16x256xf32> to vector<16xf32>
    %3 = vector.shape_cast %2 : vector<16xf32> to vector<16x1xf32>
    %cst_2 = arith.constant 2.560000e+02 : f32
    %4 = vector.broadcast %cst_2 : f32 to vector<16x1xf32>
    %5 = arith.divf %3, %4 : vector<16x1xf32>
    %6 = vector.broadcast %5 : vector<16x1xf32> to vector<16x256xf32>
    %7 = arith.subf %1, %6 : vector<16x256xf32>
    %8 = arith.mulf %7, %7 : vector<16x256xf32>
    %cst_3 = arith.constant dense<0.000000e+00> : vector<16xf32>
    %9 = vector.multi_reduction <add>, %8, %cst_3 [1] : vector<16x256xf32> to vector<16xf32>
    %10 = vector.shape_cast %9 : vector<16xf32> to vector<16x1xf32>
    %cst_4 = arith.constant 2.560000e+02 : f32
    %11 = vector.broadcast %cst_4 : f32 to vector<16x1xf32>
    %12 = arith.divf %10, %11 : vector<16x1xf32>
    %cst_5 = arith.constant 9.99999974E-6 : f32
    %13 = vector.broadcast %cst_5 : f32 to vector<16x1xf32>
    %14 = arith.addf %12, %13 : vector<16x1xf32>
    %15 = math.rsqrt %14 : vector<16x1xf32>
    %16 = vector.broadcast %15 : vector<16x1xf32> to vector<16x256xf32>
    %17 = arith.mulf %7, %16 : vector<16x256xf32>
    %c0_6 = arith.constant 0 : index
    %c0_7 = arith.constant 0 : index
    %18 = vector.load %arg4[%c0_6, %c0_7] : memref<1x256xf32, #tpu.memory_space<vmem>>, vector<1x256xf32>
    %19 = vector.broadcast %18 : vector<1x256xf32> to vector<16x256xf32>
    %20 = arith.mulf %17, %19 : vector<16x256xf32>
    %c0_8 = arith.constant 0 : index
    %c0_9 = arith.constant 0 : index
    %21 = vector.load %arg5[%c0_8, %c0_9] : memref<1x256xf32, #tpu.memory_space<vmem>>, vector<1x256xf32>
    %22 = vector.broadcast %21 : vector<1x256xf32> to vector<16x256xf32>
    %23 = arith.addf %20, %22 : vector<16x256xf32>
    %c0_10 = arith.constant 0 : index
    %c0_11 = arith.constant 0 : index
    %c0_12 = arith.constant 0 : index
    %24 = vector.load %arg3[%c0_10, %c0_11, %c0_12] : memref<1x16x1xf32, #tpu.memory_space<vmem>>, vector<1x16x1xf32>
    %25 = vector.shape_cast %24 : vector<1x16x1xf32> to vector<16x1xf32>
    %26 = vector.broadcast %25 : vector<16x1xf32> to vector<16x256xf32>
    %27 = arith.mulf %23, %26 : vector<16x256xf32>
    %c0_13 = arith.constant 0 : index
    %c0_14 = arith.constant 0 : index
    %28 = vector.load %arg6[%c0_13, %c0_14] : memref<256x32xf32, #tpu.memory_space<vmem>>, vector<256x32xf32>
    %cst_15 = arith.constant dense<0.000000e+00> : vector<16x32xf32>
    %29 = tpu.matmul %27, %28, %cst_15 {dimension_numbers = #tpu.dot_dimension_numbers<[1], [0], [0], [1], [0, 0, 1, 1], [], []>} : vector<16x256xf32>, vector<256x32xf32>, vector<16x32xf32> -> vector<16x32xf32>
    %c0_16 = arith.constant 0 : index
    %c0_17 = arith.constant 0 : index
    %30 = vector.load %arg7[%c0_16, %c0_17] : memref<1x32xf32, #tpu.memory_space<vmem>>, vector<1x32xf32>
    %31 = vector.broadcast %30 : vector<1x32xf32> to vector<16x32xf32>
    %32 = arith.addf %29, %31 : vector<16x32xf32>
    %c0_18 = arith.constant 0 : index
    %c0_19 = arith.constant 0 : index
    %c0_20 = arith.constant 0 : index
    %33 = vector.load %arg10[%c0_18, %c0_19, %c0_20] : memref<1x16x32xf32, #tpu.memory_space<vmem>>, vector<1x16x32xf32>
    %34 = vector.shape_cast %33 : vector<1x16x32xf32> to vector<16x32xf32>
    %35 = vector.shape_cast %32 : vector<16x32xf32> to vector<1x16x32xf32>
    tpu.vector_store %arg10[%c0_18, %c0_19, %c0_20], %35 {strides = array<i32>} : memref<1x16x32xf32, #tpu.memory_space<vmem>>, vector<1x16x32xf32>,
    %c0_21 = arith.constant 0 : index
    %c0_22 = arith.constant 0 : index
    %36 = vector.load %arg8[%c0_21, %c0_22] : memref<256x32xf32, #tpu.memory_space<vmem>>, vector<256x32xf32>
    %cst_23 = arith.constant dense<0.000000e+00> : vector<16x32xf32>
    %37 = tpu.matmul %27, %36, %cst_23 {dimension_numbers = #tpu.dot_dimension_numbers<[1], [0], [0], [1], [0, 0, 1, 1], [], []>} : vector<16x256xf32>, vector<256x32xf32>, vector<16x32xf32> -> vector<16x32xf32>
    %c0_24 = arith.constant 0 : index
    %c0_25 = arith.constant 0 : index
    %38 = vector.load %arg9[%c0_24, %c0_25] : memref<1x32xf32, #tpu.memory_space<vmem>>, vector<1x32xf32>
    %39 = vector.broadcast %38 : vector<1x32xf32> to vector<16x32xf32>
    %40 = arith.addf %37, %39 : vector<16x32xf32>
    %cst_26 = arith.constant 0.176776692 : f32
    %41 = vector.broadcast %cst_26 : f32 to vector<16x32xf32>
    %42 = arith.mulf %40, %41 : vector<16x32xf32>
    %c0_27 = arith.constant 0 : index
    %c0_28 = arith.constant 0 : index
    %c0_29 = arith.constant 0 : index
    %43 = vector.load %arg11[%c0_27, %c0_28, %c0_29] : memref<1x16x32xf32, #tpu.memory_space<vmem>>, vector<1x16x32xf32>
    %44 = vector.shape_cast %43 : vector<1x16x32xf32> to vector<16x32xf32>
    %45 = vector.shape_cast %42 : vector<16x32xf32> to vector<1x16x32xf32>
    tpu.vector_store %arg11[%c0_27, %c0_28, %c0_29], %45 {strides = array<i32>} : memref<1x16x32xf32, #tpu.memory_space<vmem>>, vector<1x16x32xf32>,
    return
  }
  func.func @transform_0(%arg0: i32, %arg1: i32) -> (i32, i32, i32) {
    %c0_i32 = arith.constant 0 : i32
    %c0_i32_0 = arith.constant 0 : i32
    return %arg0, %arg1, %c0_i32 : i32, i32, i32
  }
  func.func @transform_1(%arg0: i32, %arg1: i32) -> (i32, i32, i32) {
    %c0_i32 = arith.constant 0 : i32
    %c0_i32_0 = arith.constant 0 : i32
    return %arg0, %arg1, %c0_i32 : i32, i32, i32
  }
  func.func @transform_2(%arg0: i32, %arg1: i32) -> (i32, i32) {
    %c0_i32 = arith.constant 0 : i32
    %c0_i32_0 = arith.constant 0 : i32
    %c0_i32_1 = arith.constant 0 : i32
    return %c0_i32, %c0_i32_0 : i32, i32
  }
  func.func @transform_3(%arg0: i32, %arg1: i32) -> (i32, i32) {
    %c0_i32 = arith.constant 0 : i32
    %c0_i32_0 = arith.constant 0 : i32
    %c0_i32_1 = arith.constant 0 : i32
    return %c0_i32, %c0_i32_0 : i32, i32
  }
  func.func @transform_4(%arg0: i32, %arg1: i32) -> (i32, i32) {
    %c0_i32 = arith.constant 0 : i32
    %c0_i32_0 = arith.constant 0 : i32
    %c0_i32_1 = arith.constant 0 : i32
    return %c0_i32, %c0_i32_0 : i32, i32
  }
  func.func @transform_5(%arg0: i32, %arg1: i32) -> (i32, i32) {
    %c0_i32 = arith.constant 0 : i32
    %c0_i32_0 = arith.constant 0 : i32
    %c0_i32_1 = arith.constant 0 : i32
    return %c0_i32, %c0_i32_0 : i32, i32
  }
  func.func @transform_6(%arg0: i32, %arg1: i32) -> (i32, i32) {
    %c0_i32 = arith.constant 0 : i32
    %c0_i32_0 = arith.constant 0 : i32
    %c0_i32_1 = arith.constant 0 : i32
    return %c0_i32, %c0_i32_0 : i32, i32
  }
  func.func @transform_7(%arg0: i32, %arg1: i32) -> (i32, i32) {
    %c0_i32 = arith.constant 0 : i32
    %c0_i32_0 = arith.constant 0 : i32
    %c0_i32_1 = arith.constant 0 : i32
    return %c0_i32, %c0_i32_0 : i32, i32
  }
  func.func @transform_8(%arg0: i32, %arg1: i32) -> (i32, i32, i32) {
    %c0_i32 = arith.constant 0 : i32
    %c0_i32_0 = arith.constant 0 : i32
    return %arg0, %arg1, %c0_i32 : i32, i32, i32
  }
  func.func @transform_9(%arg0: i32, %arg1: i32) -> (i32, i32, i32) {
    %c0_i32 = arith.constant 0 : i32
    %c0_i32_0 = arith.constant 0 : i32
    return %arg0, %arg1, %c0_i32 : i32, i32, i32
  }
}

</mosaic_0001>

<bundles_post_ra>
// kernel: tpu_custom_call.1
= control target key start
LH: loop header
LB: loop body
LE: loop exit
PB: predicated region body
PF: predicated region fallthrough
CT: control target
= control target key end

     0   :  { %s1633_s0 = inlined_call_operand.vmem [shape: f32[2,16,256], index: 0, kind: input, shape index: {}]   ;;  %s1634_s1 = inlined_call_operand.vmem [shape: f32[2,16,1], index: 1, kind: input, shape index: {}]   ;;  %s1635_s2 = inlined_call_operand.vmem [shape: f32[1,256], index: 2, kind: input, shape index: {}]   ;;  %s1636_s3 = inlined_call_operand.vmem [shape: f32[1,256], index: 3, kind: input, shape index: {}]   ;;  %s1637_s4 = inlined_call_operand.vmem [shape: f32[256,32], index: 4, kind: input, shape index: {}]   ;;  %s1638_s5 = inlined_call_operand.vmem [shape: f32[1,32], index: 5, kind: input, shape index: {}]   ;;  %s1639_s6 = inlined_call_operand.vmem [shape: f32[256,32], index: 6, kind: input, shape index: {}]   ;;  %s1640_s7 = inlined_call_operand.vmem [shape: f32[1,32], index: 7, kind: input, shape index: {}]   ;;  %s1641_s8 = inlined_call_operand.hbm [shape: f32[2,16,32], index: 8, kind: output, shape index: {0}]   ;;  %s1642_s9 = inlined_call_operand.hbm [shape: f32[2,16,32], index: 9, kind: output, shape index: {1}]  }
   0x1   :  { %1643 = sst [smem:[#allocation8_spill]] %s1633_s0 }
   0x2   :  { %1644 = sst [smem:[#allocation9_spill]] %s1634_s1 }
   0x3   :  { %1645 = sst [smem:[#allocation10_spill]] %s1635_s2 }
   0x4   :  { %15 = vsyncpa [#allocation3], 0 }
   0x5   :  { %17 = vsyncpa [#allocation3 + $0x1], 0 }
   0x6   :  { %18 = vsyncpa [#allocation5], 0 }
   0x7   :  { %20 = vsyncpa [#allocation5 + $0x1], 0  ;;  %s1242_s30 = smov 0   ;;  %s1244_s10 = smov 0  }
   0x8   :  { %s1246_s11 = smov 0   ;;  %s1248_s12 = smov 0  }
   0x9   :  { %s1250_s13 = smov 0   ;;  %s1252_s14 = smov 0  }
   0xa LB: > { %s909_s15 = sadd.s32 4294967295, %s1185_s14   ;;  %s910_s16 = sadd.s32 4294967294, %s1185_s14   ;;  %s1185_s14 = sphi %s1252_s14, %s26_s14   ;;  %s1181_s13 = sphi %s1250_s13, %s1656_s13   ;;  %s1177_s12 = sphi %s1248_s12, %s1655_s12   ;;  %s1173_s11 = sphi %s1246_s11, %s1654_s11   ;;  %s1169_s10 = sphi %s1244_s10, %s1653_s10   ;;  %s1165_s30 = sphi %s1242_s30, %s1652_s30  }
   0xb   : > { %s38_s17 = sadd.s32 1, %s1181_s13  ;;  %s229_s18 = sadd.s32 1, %s1173_s11 }
   0xc   : > { %p40_p0 = scmp.ge.s32.totalorder %s38_s17, 2  ;;  %p239_p1 = scmp.ne.s32.totalorder %s1173_s11, %s1169_s10 }
   0xd   : > { %p240_p2 = scmp.eq.s32.totalorder %s909_s15, 1  ;;  %p245_p3 = scmp.ne.s32.totalorder %s1169_s10, %s1165_s30 }
   0xe   : > { %s1658_s17 = smov (%p40_p0, %s38_s17), 0  ;;  %p246_p5 = scmp.eq.s32.totalorder %s910_s16, 1 }
   0xf   : > { %p1282_p4 = por %p240_p2, %p239_p1  ;;  %s224_s20 = ssub.s32 %s1181_s13, %s1658_s17 }
  0x10   : > { %p913_p6 = scmp.ge.s32.totalorder %s1185_s14, 1  ;;  %p227_p7 = scmp.eq.s32.totalorder %s224_s20, 0 }
  0x11   : > { %p1289_p8 = por %p246_p5, %p245_p3  ;;  %p337_p9 = scmp.lt.s32.totalorder %s1185_s14, 3 }
  0x12   : > { %s1295_s22 = scalar_select %p227_p7, %s1173_s11, %s229_s18  }
  0x13   : > { %p338_p10 = pnand %p913_p6, %p337_p9 }
  0x14   : > { %p393_p11 = scmp.lt.s32.totalorder (!%p338_p10), %s1177_s12, 1  ;;  %s1648_s0 = sld [smem:[#allocation8_spill]] (!%p338_p10) }
  0x15   : > { %341 = sbr.rel (%p338_p10) target bundleno = 583 (0x247), region = 52  ;;  %s1649_s1 = sld [smem:[#allocation9_spill]] (!%p338_p10) }
  0x16   : > { %s1650_s2 = sld [smem:[#allocation10_spill]] (!%p338_p10)  ;;  %s1528_s26 = sand.u32 (!%p338_p10), 1, %s1169_s10  }
  0x1a   : > { %s394_s23 = scalar_select %p393_p11, %s1177_s12, 1  ;;  %v1187_v6 = vmov 0   ;;  %v531_v8 = vld [vmem:[%s1637_s4 + $0xf8] sm:$0xff]  ;;  %v530_v12 = vld [vmem:[%s1637_s4 + $0xf0] sm:$0xff]  ;;  %v529_v16 = vld [vmem:[%s1637_s4 + $0xe8] sm:$0xff]  ;;  %vm614_vm0 = vcmask 261120  }
  0x1b   : > { %1073 = vset.pattern.permute.xlu0 %v1187_v6  ;;  %1074 = vset.pattern.permute.xlu1 %v1187_v6  ;;  %v648_v9 = vld [vmem:[%s1639_s6 + $0xf8] sm:$0xff]  ;;  %v647_v13 = vld [vmem:[%s1639_s6 + $0xf0] sm:$0xff]  ;;  %v646_v17 = vld [vmem:[%s1639_s6 + $0xe8] sm:$0xff] }
  0x1c   : > { %s930_s24 = sshll.u32 %s394_s23, 5  ;;  %s931_s28 = sshll.u32 %s394_s23, 4  ;;  %v515_v10 = vld [vmem:[%s1637_s4 + $0x78] sm:$0xff]  ;;  %934 = vmatprep.subr.mxu0 %v531_v8  ;;  %972 = vmatprep.subr.mxu1 %v648_v9  ;;  %v514_v14 = vld [vmem:[%s1637_s4 + $0x70] sm:$0xff]  ;;  %v513_v32 = vld [vmem:[%s1637_s4 + $0x68] sm:$0xff] }
  0x1d   : > { %s401_s27 = scalar_lea.vmem %s1648_s0, %s930_s24  ;;  %s1305_s16 = scalar_lea.vmem %s1649_s1, %s931_s28  ;;  %v632_v11 = vld [vmem:[%s1639_s6 + $0x78] sm:$0xff]  ;;  %935 = vmatpush3.msra.mxu0 %v515_v10  ;;  %v631_v15 = vld [vmem:[%s1639_s6 + $0x70] sm:$0xff]  ;;  %v630_v33 = vld [vmem:[%s1639_s6 + $0x68] sm:$0xff] }
  0x1e   : > { %v415_v0 = vld [vmem:[%s401_s27] sm:$0xff]  ;;  %v416_v1 = vld [vmem:[%s401_s27 + $0x8] sm:$0xff]  ;;  %v417_v2 = vld [vmem:[%s401_s27 + $0x10] sm:$0xff]  ;;  %973 = vmatpush3.msra.mxu1 %v632_v11  ;;  %936 = vmatprep.subr.mxu0 %v530_v12  ;;  %s932_s24 = sshll.u32 %s1177_s12, 8  ;;  %s1188_s0 = smov [#allocation2]  }
  0x1f   : > { %v419_v3 = vadd.f32 %v416_v1, %v415_v0  ;;  %v418_v4 = vld [vmem:[%s401_s27 + $0x18] sm:$0xff]  ;;  %v484_v7 = vld [vmem:[%s1305_s16] sm:$0xff]  ;;  %974 = vmatprep.subr.mxu1 %v647_v13  ;;  %937 = vmatpush3.msra.mxu0 %v514_v14  ;;  %v526_v42 = vld [vmem:[%s1637_s4 + $0xd0] sm:$0xff]  ;;  %s914_s27 = sshll.u32 %s1528_s26, 4  ;;  %s1545_s15 = scalar_lea.hbm %s1641_s8, %s932_s24 }
  0x20   : > { %v422_v5 = vadd.f32 %v418_v4, %v417_v2  ;;  %975 = vmatpush3.msra.mxu1 %v631_v15  ;;  %938 = vmatprep.subr.mxu0 %v529_v16  ;;  %v528_v34 = vld [vmem:[%s1637_s4 + $0xe0] sm:$0xff]  ;;  %v527_v38 = vld [vmem:[%s1637_s4 + $0xd8] sm:$0xff]  ;;  %v643_v43 = vld [vmem:[%s1639_s6 + $0xd0] sm:$0xff]  ;;  %s384_s18 = scalar_lea.vmem [#allocation2], %s914_s27  ;;  %s1539_s25 = scalar_lea.vmem [#allocation4], %s914_s27 }
  0x21   : > { %420 = vadd.xlane.f32.xlu0 %v419_v3  ;;  %976 = vmatprep.subr.mxu1 %v646_v17  ;;  %v645_v35 = vld [vmem:[%s1639_s6 + $0xe0] sm:$0xff]  ;;  %v644_v39 = vld [vmem:[%s1639_s6 + $0xd8] sm:$0xff]  ;;  %v510_v44 = vld [vmem:[%s1637_s4 + $0x50] sm:$0xff]  ;;  %s756_s20 = sshll.u32 %s384_s18, 4  ;;  %s774_s23 = sshll.u32 %s1539_s25, 4  ;;  %s1547_s20 = int_to_ptr.vmem [resolvable:$true] %s756_s20  ;;  %s1557_s23 = int_to_ptr.vmem [resolvable:$true] %s774_s23 }
  0x22   : > { %939 = vmatpush3.msra.mxu0 %v513_v32  ;;  %977 = vmatpush3.msra.mxu1 %v630_v33  ;;  %v512_v36 = vld [vmem:[%s1637_s4 + $0x60] sm:$0xff]  ;;  %v511_v40 = vld [vmem:[%s1637_s4 + $0x58] sm:$0xff]  ;;  %v627_v45 = vld [vmem:[%s1639_s6 + $0x50] sm:$0xff]  ;;  %v454_v32 = vlaneseq  ;;  %s1079_s29 = scalar_lea.vmem %s1547_s20, 256  ;;  %s1083_s1 = sshll.u32 %s1188_s0, 4  ;;  %s1084_s1 = int_to_ptr.vmem [resolvable:$false] %s1083_s1 }
  0x23   : > { %940 = vmatprep.subr.mxu0 %v528_v34  ;;  %978 = vmatprep.subr.mxu1 %v645_v35  ;;  %v629_v37 = vld [vmem:[%s1639_s6 + $0x60] sm:$0xff]  ;;  %v628_v41 = vld [vmem:[%s1639_s6 + $0x58] sm:$0xff]  ;;  %v525_v46 = vld [vmem:[%s1637_s4 + $0xc8] sm:$0xff]  ;;  %p1080_p12 = scmp.ne.s32.totalorder %s1547_s20, %s1079_s29  ;;  %p1086_p1 = scmp.lt.s32.totalorder %s1547_s20, %s1084_s1 }
  0x24   : > { %941 = vmatpush3.msra.mxu0 %v512_v36  ;;  %979 = vmatpush3.msra.mxu1 %v629_v37  ;;  %v642_v47 = vld [vmem:[%s1639_s6 + $0xc8] sm:$0xff]  ;;  %v524_v51 = vld [vmem:[%s1637_s4 + $0xc0] sm:$0xff]  ;;  %v523_v55 = vld [vmem:[%s1637_s4 + $0xb8] sm:$0xff]  ;;  %v455_v34 = vshrl.u32 %v454_v32, 7 }
  0x25   : > { %423 = vadd.xlane.f32.xlu0 %v422_v5  ;;  %942 = vmatprep.subr.mxu0 %v527_v38  ;;  %v485_v48 = vld [vmem:[%s1305_s16 + $0x8] sm:$0xff]  ;;  %v641_v52 = vld [vmem:[%s1639_s6 + $0xc0] sm:$0xff]  ;;  %v640_v56 = vld [vmem:[%s1639_s6 + $0xb8] sm:$0xff]  ;;  %s1555_s16 = scalar_lea.hbm %s1642_s9, %s932_s24  ;;  %p1081_p13 = pnand %p1080_p12, %p1282_p4 }
  0x26   : > { %980 = vmatprep.subr.mxu1 %v644_v39  ;;  %943 = vmatpush3.msra.mxu0 %v511_v40  ;;  %v509_v49 = vld [vmem:[%s1637_s4 + $0x48] sm:$0xff]  ;;  %v508_v53 = vld [vmem:[%s1637_s4 + $0x40] sm:$0xff]  ;;  %v507_v57 = vld [vmem:[%s1637_s4 + $0x38] sm:$0xff]  ;;  %v456_v35 = vsub.s32 0, %v455_v34  ;;  %v460_v36 = vsub.s32 1, %v455_v34 }
  0x27   : > { %981 = vmatpush3.msra.mxu1 %v628_v41  ;;  %944 = vmatprep.subr.mxu0 %v526_v42  ;;  %v626_v50 = vld [vmem:[%s1639_s6 + $0x48] sm:$0xff]  ;;  %v625_v54 = vld [vmem:[%s1639_s6 + $0x40] sm:$0xff]  ;;  %v624_v58 = vld [vmem:[%s1639_s6 + $0x38] sm:$0xff]  ;;  %p1082_p0 = pneg %p1081_p13 }
  0x28   : > { %982 = vmatprep.subr.mxu1 %v643_v43  ;;  %945 = vmatpush3.msra.mxu0 %v510_v44  ;;  %v522_v59 = vld [vmem:[%s1637_s4 + $0xb0] sm:$0xff]  ;;  %v521_v63 = vld [vmem:[%s1637_s4 + $0xa8] sm:$0xff]  ;;  %v520_v3 = vld [vmem:[%s1637_s4 + $0xa0] sm:$0xff] }
  0x29   : > { %983 = vmatpush3.msra.mxu1 %v627_v45  ;;  %946 = vmatprep.subr.mxu0 %v525_v46  ;;  %v639_v60 = vld [vmem:[%s1639_s6 + $0xb0] sm:$0xff]  ;;  %v504_v5 = vld [vmem:[%s1637_s4 + $0x20] sm:$0xff]  ;;  %v636_v8 = vld [vmem:[%s1639_s6 + $0x98] sm:$0xff] }
  0x2a   : > { %984 = vmatprep.subr.mxu1 %v642_v47  ;;  %947 = vmatpush3.msra.mxu0 %v509_v49  ;;  %v506_v61 = vld [vmem:[%s1637_s4 + $0x30] sm:$0xff]  ;;  %v621_v6 = vld [vmem:[%s1639_s6 + $0x20] sm:$0xff]  ;;  %v503_v9 = vld [vmem:[%s1637_s4 + $0x18] sm:$0xff] }
  0x2b   : > { %985 = vmatpush3.msra.mxu1 %v626_v50  ;;  %948 = vmatprep.subr.mxu0 %v524_v51  ;;  %v623_v62 = vld [vmem:[%s1639_s6 + $0x30] sm:$0xff]  ;;  %v620_v10 = vld [vmem:[%s1639_s6 + $0x18] sm:$0xff]  ;;  %v517_v15 = vld [vmem:[%s1637_s4 + $0x88] sm:$0xff] }
  0x2c   : > { %986 = vmatprep.subr.mxu1 %v641_v52  ;;  %949 = vmatpush3.msra.mxu0 %v508_v53  ;;  %v518_v11 = vld [vmem:[%s1637_s4 + $0x90] sm:$0xff]  ;;  %v634_v16 = vld [vmem:[%s1639_s6 + $0x88] sm:$0xff]  ;;  %v452_v37 = vld [vmem:[%s1650_s2] sm:$0x3]  ;;  %s1085_s2 = scalar_lea.vmem %s1084_s1, 512 }
  0x2d   : > { %987 = vmatpush3.msra.mxu1 %v625_v54  ;;  %950 = vmatprep.subr.mxu0 %v523_v55  ;;  %v635_v12 = vld [vmem:[%s1639_s6 + $0x90] sm:$0xff]  ;;  %v501_v17 = vld [vmem:[%s1637_s4 + $0x8] sm:$0xff]  ;;  %v468_v38 = vld [vmem:[%s1636_s3] sm:$0x3]  ;;  %v457_v39 = vrot.slane %v452_v37, %v456_v35  ;;  %v461_v40 = vrot.slane %v452_v37, %v460_v36  ;;  %p1087_p2 = scmp.lt.s32.totalorder %s1085_s2, %s1079_s29 }
  0x2e   : > { %988 = vmatprep.subr.mxu1 %v640_v56  ;;  %951 = vmatpush3.msra.mxu0 %v507_v57  ;;  %v502_v13 = vld [vmem:[%s1637_s4 + $0x10] sm:$0xff]  ;;  %v473_v44 = vrot.slane %v468_v38, %v456_v35  ;;  %v477_v45 = vrot.slane %v468_v38, %v460_v36 }
  0x2f   : > { %989 = vmatpush3.msra.mxu1 %v624_v58  ;;  %952 = vmatprep.subr.mxu0 %v522_v59  ;;  %v619_v14 = vld [vmem:[%s1639_s6 + $0x10] sm:$0xff]  ;;  %p1088_p3 = por %p1087_p2, %p1086_p1 }
  0x30   : > { %990 = vmatprep.subr.mxu1 %v639_v60  ;;  %953 = vmatpush3.msra.mxu0 %v506_v61  ;;  %v920_v61 = vld [vmem:[%s1638_s5] ss:$0 sm:$0xff] }
  0x31   : > { %991 = vmatpush3.msra.mxu1 %v623_v62  ;;  %954 = vmatprep.subr.mxu0 %v521_v63  ;;  %v921_v63 = vld [vmem:[%s1640_s7] ss:$0 sm:$0xff]  ;;  %p1089_p5 = pnand %p1088_p3, %p1082_p0 }
  0x3b   : > { %488 = vperm.xlu0 %1073, %v484_v7   ;;  %v519_v7 = vld [vmem:[%s1637_s4 + $0x98] sm:$0xff] }
  0xaa   : > { %v421_v18 = vpop.xlane.xlu0 %420 }
  0xab   : > { %v426_v19 = vmul.f32 0.00390625, %v421_v18  ;;  %v618_v18 = vld [vmem:[%s1639_s6 + $0x8] sm:$0xff] }
  0xad   : > { %v1338_v20 = vsub.f32 %v415_v0, %v426_v19  ;;  %v1340_v21 = vsub.f32 %v416_v1, %v426_v19  ;;  %v638_v0 = vld [vmem:[%s1639_s6 + $0xa8] sm:$0xff]  ;;  %v516_v19 = vld [vmem:[%s1637_s4 + $0x80] sm:$0xff] }
  0xae   : > { %v424_v22 = vpop.xlane.xlu0 %423  ;;  %v505_v1 = vld [vmem:[%s1637_s4 + $0x28] sm:$0xff]  ;;  %992 = vmatprep.subr.mxu1 %v638_v0 }
  0xaf   : > { %v427_v23 = vmul.f32 0.00390625, %v424_v22  ;;  %v432_v24 = vmul.f32 %v1338_v20, %v1338_v20  ;;  %v433_v25 = vmul.f32 %v1340_v21, %v1340_v21  ;;  %955 = vmatpush3.msra.mxu0 %v505_v1  ;;  %v633_v22 = vld [vmem:[%s1639_s6 + $0x80] sm:$0xff] }
  0xb0   : > { %956 = vmatprep.subr.mxu0 %v520_v3 }
  0xb1   : > { %v1346_v26 = vsub.f32 %v417_v2, %v427_v23  ;;  %v1348_v27 = vsub.f32 %v418_v4, %v427_v23  ;;  %v436_v28 = vadd.f32 %v433_v25, %v432_v24  ;;  %v622_v2 = vld [vmem:[%s1639_s6 + $0x28] sm:$0xff]  ;;  %v637_v4 = vld [vmem:[%s1639_s6 + $0xa0] sm:$0xff]  ;;  %957 = vmatpush3.msra.mxu0 %v504_v5 }
  0xb2   : > { %993 = vmatpush3.msra.mxu1 %v622_v2  ;;  %958 = vmatprep.subr.mxu0 %v519_v7  ;;  %v500_v23 = vld [vmem:[%s1637_s4] sm:$0xff] }
  0xb3   : > { %437 = vadd.xlane.f32.xlu1 %v436_v28  ;;  %v434_v29 = vmul.f32 %v1346_v26, %v1346_v26  ;;  %v435_v30 = vmul.f32 %v1348_v27, %v1348_v27  ;;  %994 = vmatprep.subr.mxu1 %v637_v4  ;;  %v617_v24 = vld [vmem:[%s1639_s6] sm:$0xff] }
  0xb4   : > { %995 = vmatpush3.msra.mxu1 %v621_v6  ;;  %959 = vmatpush3.msra.mxu0 %v503_v9 }
  0xb5   : > { %v439_v31 = vadd.f32 %v435_v30, %v434_v29  ;;  %996 = vmatprep.subr.mxu1 %v636_v8  ;;  %960 = vmatprep.subr.mxu0 %v518_v11 }
  0xb6   : > { %997 = vmatpush3.msra.mxu1 %v620_v10  ;;  %961 = vmatpush3.msra.mxu0 %v502_v13  ;;  %v489_v49 = vpop.permute.xlu0 %488 }
  0xb7   : > { %440 = vadd.xlane.f32.xlu1 %v439_v31  ;;  %998 = vmatprep.subr.mxu1 %v635_v12 }
  0xb8   : > { %999 = vmatpush3.msra.mxu1 %v619_v14  ;;  %962 = vmatprep.subr.mxu0 %v517_v15 }
  0xb9   : > { %1000 = vmatprep.subr.mxu1 %v634_v16  ;;  %963 = vmatpush3.msra.mxu0 %v501_v17 }
  0xba   : > { %1001 = vmatpush3.msra.mxu1 %v618_v18  ;;  %964 = vmatprep.subr.mxu0 %v516_v19 }
  0xbb   : > { %1002 = vmatprep.subr.mxu1 %v633_v22  ;;  %965 = vmatpush3.msra.mxu0 %v500_v23 }
  0xbc   : > { %1003 = vmatpush3.msra.mxu1 %v617_v24 }
  0xc8   : > { %493 = vperm.xlu1 %1074, %v485_v48  }
 0x13c   : > { %v438_v25 = vpop.xlane.xlu1 %437 }
 0x13d   : > { %v442_v28 = vmul.f32 0.00390625, %v438_v25 }
 0x13f   : > { %v444_v29 = vadd.f32 1e-05, %v442_v28 }
 0x140   : > { %v441_v30 = vpop.xlane.xlu1 %440 }
 0x141   : > { %1075 = vrsqrt.f32 %v444_v29  ;;  %v443_v31 = vmul.f32 0.00390625, %v441_v30 }
 0x143   : > { %v445_v33 = vadd.f32 1e-05, %v443_v31 }
 0x145   : > { %1077 = vrsqrt.f32 %v445_v33 }
 0x14e   : > { %v1076_v41 = vpop.eup %1075 }
 0x14f   : > { %v448_v42 = vmul.f32 %v1076_v41, %v1338_v20  ;;  %v449_v43 = vmul.f32 %v1076_v41, %v1340_v21  ;;  %v494_v20 = vpop.permute.xlu1 %493 }
 0x151   : > { %v464_v46 = vmul.f32 %v457_v39, %v448_v42  ;;  %v465_v47 = vmul.f32 %v461_v40, %v449_v43 }
 0x152   : > { %v1078_v48 = vpop.eup %1077 }
 0x153   : > { %v480_v50 = vadd.f32 %v473_v44, %v464_v46  ;;  %v481_v51 = vadd.f32 %v477_v45, %v465_v47  ;;  %v450_v52 = vmul.f32 %v1078_v48, %v1346_v26  ;;  %v451_v53 = vmul.f32 %v1078_v48, %v1348_v27 }
 0x155   : > { %v496_v54 = vmul.f32 %v489_v49, %v480_v50  ;;  %v497_v55 = vmul.f32 %v489_v49, %v481_v51  ;;  %v466_v56 = vmul.f32 %v457_v39, %v450_v52  ;;  %v467_v57 = vmul.f32 %v461_v40, %v451_v53 }
 0x157   : > { %603 = vmatprep.mubr.f32.mxu0 %v497_v55  ;;  %720 = vmatprep.mubr.f32.mxu1 %v497_v55  ;;  %v482_v21 = vadd.f32 %v473_v44, %v466_v56  ;;  %v483_v58 = vadd.f32 %v477_v45, %v467_v57 }
 0x158   : > { %604 = vmatmul.mubr.f32.vlgmr.msra.gmra.mxu0 %v496_v54  ;;  %721 = vmatmul.mubr.f32.vlgmr.msra.gmra.mxu1 %v496_v54 }
 0x159   : > { %v498_v59 = vmul.f32 %v494_v20, %v482_v21  ;;  %v499_v60 = vmul.f32 %v494_v20, %v483_v58 }
 0x15b   : > { %608 = vmatprep.mubr.f32.mxu0 %v499_v60  ;;  %725 = vmatprep.mubr.f32.mxu1 %v499_v60 }
 0x15c   : > { %609 = vmatmul.mubr.f32.gmra.mxu0 %v498_v59  ;;  %726 = vmatmul.mubr.f32.gmra.mxu1 %v498_v59 }
 0x218   : > { %v966_v26 = vpop.f32.mrf.mxu0  ;;  %v1004_v27 = vpop.f32.mrf.mxu1 }
 0x21a   : > { %v967_v62 = vpop.f32.mrf.mxu0  ;;  %v1005_v0 = vpop.f32.mrf.mxu1 }
 0x21b   : > { %v968_v1 = vadd.f32 %v967_v62, %v966_v26  ;;  %v1006_v2 = vadd.f32 %v1005_v0, %v1004_v27 }
 0x21c   : > { %v969_v3 = vpop.f32.mrf.mxu0  ;;  %v1007_v4 = vpop.f32.mrf.mxu1 }
 0x21d   : > { %v606_v5 = vadd.f32 %v968_v1, %v920_v61  ;;  %v723_v6 = vadd.f32 %v1006_v2, %v921_v63 }
 0x21e   : > { %v970_v7 = vpop.f32.mrf.mxu0  ;;  %v1008_v8 = vpop.f32.mrf.mxu1 }
 0x21f   : > { %615 = vst.msk [vmem:[%s384_s18] sm:$0xff] %vm614_vm0, %v606_v5  ;;  %v731_v9 = vmul.f32 0.17677669, %v723_v6  ;;  %v971_v10 = vadd.f32 %v970_v7, %v969_v3  ;;  %v1009_v11 = vadd.f32 %v1008_v8, %v1007_v4 }
 0x221   : > { %733 = vst.msk [vmem:[%s1539_s25] sm:$0xff] %vm614_vm0, %v731_v9  ;;  %v611_v12 = vadd.f32 %v971_v10, %v920_v61  ;;  %v728_v13 = vadd.f32 %v1009_v11, %v921_v63 }
 0x223   : > { %616 = vst.msk [vmem:[%s384_s18 + $0x8] sm:$0xff] %vm614_vm0, %v611_v12  ;;  %v732_v14 = vmul.f32 0.17677669, %v728_v13 }
 0x224   : > { %1092 = shalt.err (!%p1089_p5)
}
 0x225   : > { %s1093_s18 = scalar_lea.hbm %s1545_s15, 256  ;;  %s1097_s0 = scalar_lea.hbm %s1641_s8, 512 }
 0x226   : > { %p1094_p6 = scmp.ne.s32.totalorder %s1545_s15, %s1093_s18  ;;  %p1098_p10 = scmp.lt.s32.totalorder %s1545_s15, %s1641_s8 }
 0x227   : > { %p1099_p11 = scmp.lt.s32.totalorder %s1097_s0, %s1093_s18 }
 0x228   : > { %p1095_p7 = pnand %p1094_p6, %p1282_p4 }
 0x229   : > { %p1100_p12 = por %p1099_p11, %p1098_p10 }
 0x22a   : > { %p1096_p9 = pneg %p1095_p7 }
 0x22c   : > { %p1101_p13 = pnand %p1100_p12, %p1096_p9 }
 0x22e   : > { %1104 = shalt.err (!%p1101_p13)
}
 0x22f   : > { %s1189_s1 = smov 128   ;;  %s1190_s2 = smov 8   ;;  %734 = vst.msk [vmem:[%s1539_s25 + $0x8] sm:$0xff] %vm614_vm0, %v732_v14 }
 0x230   : > { %s1651_s28 = scalar_lea.sflag [#allocation3], %s1528_s26  ;;  %s741_s29 = scalar_lea.sflag [#allocation5], %s1528_s26 }
 0x231   : > { %1010 = dma.vmem_to_hbm [thread:$0]  (%p1282_p4), %s1547_s20, 256, %s1545_s15, %s1651_s28, %s1189_s1, %s1189_s1, %s1190_s2  }
 0x232   : > { %s1105_s18 = scalar_lea.vmem %s1557_s23, 256  ;;  %s1191_s24 = smov [#allocation4]  }
 0x233   : > { %p1106_p0 = scmp.ne.s32.totalorder %s1557_s23, %s1105_s18  ;;  %s1109_s12 = sshll.u32 %s1191_s24, 4  ;;  %s1110_s12 = int_to_ptr.vmem [resolvable:$false] %s1109_s12 }
 0x234   : > { %s1111_s0 = scalar_lea.vmem %s1110_s12, 512  ;;  %p1112_p3 = scmp.lt.s32.totalorder %s1557_s23, %s1110_s12 }
 0x235   : > { %p1107_p1 = pnand %p1106_p0, %p1282_p4  ;;  %p1113_p5 = scmp.lt.s32.totalorder %s1111_s0, %s1105_s18 }
 0x237   : > { %p1108_p2 = pneg %p1107_p1  ;;  %p1114_p6 = por %p1113_p5, %p1112_p3 }
 0x239   : > { %p1115_p7 = pnand %p1114_p6, %p1108_p2 }
 0x23b   : > { %1118 = shalt.err (!%p1115_p7)
}
 0x23c   : > { %s1119_s20 = scalar_lea.hbm %s1555_s16, 256  ;;  %s1123_s15 = scalar_lea.hbm %s1642_s9, 512 }
 0x23d   : > { %p1120_p9 = scmp.ne.s32.totalorder %s1555_s16, %s1119_s20  ;;  %p1124_p12 = scmp.lt.s32.totalorder %s1555_s16, %s1642_s9 }
 0x23e   : > { %p1125_p13 = scmp.lt.s32.totalorder %s1123_s15, %s1119_s20 }
 0x23f   : > { %p1121_p10 = pnand %p1120_p9, %p1282_p4 }
 0x240   : > { %p1126_p0 = por %p1125_p13, %p1124_p12 }
 0x241   : > { %p1122_p11 = pneg %p1121_p10 }
 0x243   : > { %p1127_p1 = pnand %p1126_p0, %p1122_p11 }
 0x245   : > { %1130 = shalt.err (!%p1127_p1)
}
 0x246   : > { %1011 = dma.vmem_to_hbm [thread:$0]  (%p1282_p4), %s1557_s23, 256, %s1555_s16, %s741_s29, %s1189_s1, %s1189_s1, %s1190_s2  }
 0x247 PF: > { %p1021_p2 = scmp.ge.s32.totalorder %s1185_s14, 2  ;;  %s789_s18 = sand.u32 1, %s1165_s30  }
 0x248   : > { %s790_s24 = scalar_lea.sflag [#allocation3], %s789_s18 }
 0x249   : > { %p1015_p3 = pnand %p1021_p2, %p1289_p8 }
 0x24b   : > { %p1016_p5 = pneg %p1015_p3 }
 0x24d   : > { %1156 = dma.done.wait (%p1016_p5), %s790_s24, 256  }
 0x24e   : > { %1158 = vsyncadd (%p1016_p5), %s790_s24, 4294967040  ;;  %s799_s12 = scalar_lea.sflag [#allocation5], %s789_s18 }
 0x24f   : > { %1160 = dma.done.wait (%p1016_p5), %s799_s12, 256  }
 0x250   : > { %1162 = vsyncadd (%p1016_p5), %s799_s12, 4294967040  ;;  %s26_s14 = sadd.s32 1, %s1185_s14   ;;  %s1652_s30 = smov %s1169_s10 }
 0x251   : > { %p23_p6 = scmp.ge.s32.totalorder %s26_s14, 4   ;;  %s1653_s10 = smov %s1173_s11 }
 0x252   : > { %s1654_s11 = smov %s1295_s22  ;;  %s1655_s12 = smov %s1181_s13 }
 0x253   : > { %s1656_s13 = smov %s1658_s17  ;;  %25 = sbr.rel (!%p23_p6) target bundleno = 10 (0xa), region = 107 }
 0x258   :  { %804 = vsyncpa [#allocation3], 1 }
 0x259   :  { %806 = vsyncpa [#allocation3 + $0x1], 1 }
 0x25a   :  { %807 = vsyncpa [#allocation5], 1 }
 0x25b   :  { %809 = vsyncpa [#allocation5 + $0x1], 1 }

</bundles_post_ra>
